<compile_context>
chip_gen: v6e
topology: v6e:2x2x1
jax: 0.10.0
libtpu: 0.0.40
codegen_flags: <defaults>
</compile_context>

<pallas_src>
import numpy as np
import jax
import jax.numpy as jnp
from jax.experimental import pallas as pl
from jax.experimental.pallas import tpu as pltpu

BN_EPS = 1e-5


# ----------------------------------------------------------------------------
# Host-side (shape-only / weight-folding) constant builders
# ----------------------------------------------------------------------------
def _interp_matrix(n_in, n_out):
    """Bilinear interpolation matrix (align_corners=True), shape (n_out, n_in)."""
    m = np.zeros((n_out, n_in), np.float32)
    for i in range(n_out):
        src = i * (n_in - 1) / (n_out - 1) if n_out > 1 else 0.0
        i0 = min(max(int(np.floor(src)), 0), n_in - 1)
        i1 = min(i0 + 1, n_in - 1)
        f = src - i0
        m[i, i0] += 1.0 - f
        m[i, i1] += f
    return m


def _row_op_stack(hin, ho, h, py0):
    """Fold row interp + F.pad row offset + conv dy tap into (3h, hin)."""
    wh = _interp_matrix(hin, ho)                       # (ho, hin)
    m = np.zeros((3 * h, hin), np.float32)
    for dy in range(3):
        delta = dy - 1 - py0
        sel = np.zeros((h, ho), np.float32)            # out[r] = up[r + delta]
        for r in range(h):
            rr = r + delta
            if 0 <= rr < ho:
                sel[r, rr] = 1.0
        m[dy * h:(dy + 1) * h] = sel @ wh
    return m


def _conv_band_matrices(w_hwio, ch_lo, ch_hi, in_w, out_w, col_off):
    """Banded conv weights: fold (dx taps, width, channel group) into K/N dims.

    Returns (3, in_w*cg, out_w*cout) with
      band[dy, iw*cg + ci, ow*cout + co] = w_hwio[dy, dx, ch_lo+ci, co]
    where dx = iw - ow + 1 + col_off (only where 0 <= dx < 3).  This implements
    the width-direction taps, the conv zero padding and the F.pad column
    offset of the upsampled stream, all inside the weight matrix.
    """
    kh, kw, _, cout = w_hwio.shape
    cg = ch_hi - ch_lo
    sel = np.zeros((kw, out_w, in_w), np.float32)
    for dx in range(kw):
        for ow in range(out_w):
            iw = ow - 1 + dx - col_off
            if 0 <= iw < in_w:
                sel[dx, ow, iw] = 1.0
    w_g = w_hwio[:, :, ch_lo:ch_hi, :]                      # (3, 3, cg, cout)
    band = jnp.einsum("xoi,yxgc->yigoc", sel, w_g)          # (3, in_w, cg, out_w, cout)
    return band.reshape(kh, in_w * cg, out_w * cout).astype(jnp.float32)


# ----------------------------------------------------------------------------
# Fused kernel
# ----------------------------------------------------------------------------
def _up_fused_kernel(x1_ref, x2_ref, m_ref, w1_ref, w2_ref, par_ref, o_ref):
    f32 = jnp.float32
    bf16 = jnp.bfloat16

    x1 = x1_ref[0]                       # (hin, win*c1) f32, lane-packed
    x2 = x2_ref[0]                       # (h,   w*c2)   f32, lane-packed
    par = par_ref[...]                   # (6, w*cout)   f32
    h = x2.shape[0]

    # --- up stream: row interp + F.pad row offset + dy shift in ONE host
    # constant; width interp / column pad / dx taps live inside w1_ref. -------
    xs = jnp.dot(m_ref[...], x1, preferred_element_type=f32)   # (3h, win*c1)

    def _shifted(a):
        """Row-shifted copies a[r-1], a[r], a[r+1] (zero boundary row)."""
        z = jnp.zeros((1, a.shape[1]), a.dtype)
        prev = jnp.concatenate([z, a[:-1]], axis=0)
        nxt = jnp.concatenate([a[1:], z], axis=0)
        return prev, a, nxt

    # --- conv1 over concat([x2, pad(up)]): ONE long-K lane-dense matmul ------
    s0, s1, s2 = _shifted(x2)
    a_cat = jnp.concatenate(
        [s0, s1, s2, xs[0:h], xs[h:2 * h], xs[2 * h:3 * h]],
        axis=1).astype(bf16)                                    # (h, 3*(w*c2+win*c1))
    acc1 = jnp.dot(a_cat, w1_ref[...], preferred_element_type=f32)
    a1 = jnp.maximum(acc1 + par[0:1, :], 0.0)                   # bias + ReLU
    a1 = a1 * par[1:2, :] + par[2:3, :]                         # BN1 (eval)

    # --- conv2: ONE long-K lane-dense matmul ---------------------------------
    t0, t1, t2 = _shifted(a1)
    a2_cat = jnp.concatenate([t0, t1, t2], axis=1).astype(bf16)  # (h, 3*w*cout)
    acc2 = jnp.dot(a2_cat, w2_ref[...], preferred_element_type=f32)
    a2 = jnp.maximum(acc2 + par[3:4, :], 0.0)                   # bias + ReLU
    a2 = a2 * par[4:5, :] + par[5:6, :]                         # BN2 (eval)

    o_ref[...] = a2[None].astype(o_ref.dtype)                   # (1, h, w*cout)


# ----------------------------------------------------------------------------
# Python wrapper: layout plumbing + constant folding + pallas_call
# ----------------------------------------------------------------------------
def up_forward(x1_nchw, x2_nchw, params):
    """Forward of `up(in_ch, out_ch, bilinear=True)`; inputs/outputs NCHW."""
    n, c1, hin, win = x1_nchw.shape
    _, c2, h, w = x2_nchw.shape
    ho, wo = 2 * hin, 2 * win
    cin = c1 + c2
    cout = params["w1"].shape[0]
    py0 = (h - ho) // 2                 # F.pad row offset
    px0 = (w - wo) // 2                 # F.pad column offset
    if py0 < 0 or px0 < 0:
        raise NotImplementedError("negative F.pad (crop) is not supported")

    # NCHW -> lane-packed (N, H, W*C) layout (cheap one-time XLA reshuffle).
    x1_2d = jnp.transpose(x1_nchw, (0, 2, 3, 1)).reshape(n, hin, win * c1)
    x2_2d = jnp.transpose(x2_nchw, (0, 2, 3, 1)).reshape(n, h, w * c2)

    # Row operator for the up stream (interp + pad + dy shift), (3h, hin).
    m_stack = jnp.asarray(_row_op_stack(hin, ho, h, py0))

    # Width interpolation, folded into the up-stream conv band below.
    ww = _interp_matrix(win, wo)                                   # (wo, win)
    wwc = np.kron(ww.T, np.eye(c1, dtype=np.float32))              # (win*c1, wo*c1)

    # Conv weights -> banded matrices (OIHW -> HWIO, split by concat group),
    # then stack the 3 dy taps (and both conv1 streams) along K.
    w1_hwio = jnp.transpose(params["w1"], (2, 3, 1, 0))            # (3,3,cin,cout)
    w2_hwio = jnp.transpose(params["w2"], (2, 3, 1, 0))            # (3,3,cout,cout)
    band1a = _conv_band_matrices(w1_hwio, 0, c2, w, w, 0)          # (3, w*c2,  w*cout)
    band1b = _conv_band_matrices(w1_hwio, c2, cin, wo, w, px0)     # (3, wo*c1, w*cout)
    band1b = jnp.einsum("ik,dkn->din", jnp.asarray(wwc), band1b)   # (3, win*c1, w*cout)
    band2 = _conv_band_matrices(w2_hwio, 0, cout, w, w, 0)         # (3, w*cout, w*cout)

    w1_big = jnp.concatenate(
        [band1a.reshape(3 * w * c2, w * cout),
         band1b.reshape(3 * win * c1, w * cout)], axis=0).astype(jnp.bfloat16)
    w2_big = band2.reshape(3 * w * cout, w * cout).astype(jnp.bfloat16)
    k1 = 3 * w * c2 + 3 * win * c1

    # bias / BN scale / BN shift packed into one lane-dense (6, w*cout) block.
    def _bn_affine(g, b, mu, var):
        s = g / jnp.sqrt(var + BN_EPS)
        return s, b - mu * s

    s1, t1 = _bn_affine(params["bn1_gamma"], params["bn1_beta"],
                        params["bn1_mean"], params["bn1_var"])
    s2, t2 = _bn_affine(params["bn2_gamma"], params["bn2_beta"],
                        params["bn2_mean"], params["bn2_var"])
    par = jnp.stack([jnp.tile(v.astype(jnp.float32), w) for v in
                     (params["b1"], s1, t1, params["b2"], s2, t2)])    # (6, w*cout)

    out2d = pl.pallas_call(
        _up_fused_kernel,
        out_shape=jax.ShapeDtypeStruct((n, h, w * cout), x2_nchw.dtype),
        grid=(n,),
        in_specs=[
            pl.BlockSpec((1, hin, win * c1), lambda b: (b, 0, 0)),
            pl.BlockSpec((1, h, w * c2), lambda b: (b, 0, 0)),
            pl.BlockSpec((3 * h, hin), lambda b: (0, 0)),
            pl.BlockSpec((k1, w * cout), lambda b: (0, 0)),
            pl.BlockSpec((3 * w * cout, w * cout), lambda b: (0, 0)),
            pl.BlockSpec((6, w * cout), lambda b: (0, 0)),
        ],
        out_specs=pl.BlockSpec((1, h, w * cout), lambda b: (b, 0, 0)),
        compiler_params=pltpu.CompilerParams(
            dimension_semantics=("parallel",)),
    )(x1_2d, x2_2d, m_stack, w1_big, w2_big, par)

    out = out2d.reshape(n, h, w, cout)                # lane-dense store -> NHWC
    return jnp.transpose(out, (0, 3, 1, 2))           # back to NCHW


# ----------------------------------------------------------------------------
# Parameters (deterministic, synthetic)
# ----------------------------------------------------------------------------
def init_up_params(key, in_ch, out_ch):
    ks = jax.random.split(key, 12)
    p = {}
    p["w1"] = 0.1 * jax.random.normal(ks[0], (out_ch, in_ch, 3, 3), jnp.float32)
    p["b1"] = 0.1 * jax.random.normal(ks[1], (out_ch,), jnp.float32)
    p["bn1_gamma"] = 1.0 + 0.1 * jax.random.normal(ks[2], (out_ch,), jnp.float32)
    p["bn1_beta"] = 0.1 * jax.random.normal(ks[3], (out_ch,), jnp.float32)
    p["bn1_mean"] = 0.1 * jax.random.normal(ks[4], (out_ch,), jnp.float32)
    p["bn1_var"] = 1.0 + 0.1 * jnp.abs(jax.random.normal(ks[5], (out_ch,), jnp.float32))
    p["w2"] = 0.1 * jax.random.normal(ks[6], (out_ch, out_ch, 3, 3), jnp.float32)
    p["b2"] = 0.1 * jax.random.normal(ks[7], (out_ch,), jnp.float32)
    p["bn2_gamma"] = 1.0 + 0.1 * jax.random.normal(ks[8], (out_ch,), jnp.float32)
    p["bn2_beta"] = 0.1 * jax.random.normal(ks[9], (out_ch,), jnp.float32)
    p["bn2_mean"] = 0.1 * jax.random.normal(ks[10], (out_ch,), jnp.float32)
    p["bn2_var"] = 1.0 + 0.1 * jnp.abs(jax.random.normal(ks[11], (out_ch,), jnp.float32))
    return p


# ----------------------------------------------------------------------------
# Pure-JAX reference (f32, HIGHEST precision) for the on-device spot-check
# ----------------------------------------------------------------------------
def _reference_up(x1_nchw, x2_nchw, p):
    n, c1, hin, win = x1_nchw.shape
    _, c2, h, w = x2_nchw.shape
    ho, wo = 2 * hin, 2 * win
    wh = jnp.asarray(_interp_matrix(hin, ho))
    ww = jnp.asarray(_interp_matrix(win, wo))
    x1u = jnp.einsum("ah,nchw->ncaw", wh, x1_nchw)
    x1u = jnp.einsum("bw,ncaw->ncab", ww, x1u)
    dy_, dx_ = h - ho, w - wo
    x1u = jnp.pad(x1u, ((0, 0), (0, 0),
                        (dy_ // 2, dy_ - dy_ // 2),
                        (dx_ // 2, dx_ - dx_ // 2)))
    x = jnp.concatenate([x2_nchw, x1u], axis=1)

    def conv_relu_bn(x, wgt, b, g, bta, mu, var):
        y = jax.lax.conv_general_dilated(
            x, wgt, window_strides=(1, 1), padding=((1, 1), (1, 1)),
            dimension_numbers=("NCHW", "OIHW", "NCHW"),
            precision=jax.lax.Precision.HIGHEST)
        y = jnp.maximum(y + b[None, :, None, None], 0.0)
        scale = g / jnp.sqrt(var + BN_EPS)
        shift = bta - mu * scale
        return y * scale[None, :, None, None] + shift[None, :, None, None]

    x = conv_relu_bn(x, p["w1"], p["b1"], p["bn1_gamma"], p["bn1_beta"],
                     p["bn1_mean"], p["bn1_var"])
    x = conv_relu_bn(x, p["w2"], p["b2"], p["bn2_gamma"], p["bn2_beta"],
                     p["bn2_mean"], p["bn2_var"])
    return x


if __name__ == "__main__":
    key = jax.random.PRNGKey(0)
    k1, k2, kp = jax.random.split(key, 3)

    N, in_ch, out_ch = 2, 8, 8
    H2, W2 = 16, 16                      # spatial size of the skip tensor x2
    # x1: lower-resolution decoder feature; x2: encoder skip connection.
    x1 = jax.random.normal(k1, (N, in_ch // 2, H2 // 2, W2 // 2), jnp.float32)
    x2 = jax.random.normal(k2, (N, in_ch - in_ch // 2, H2, W2), jnp.float32)

    params = init_up_params(kp, in_ch, out_ch)

    out = up_forward(x1, x2, params)
    out = jax.block_until_ready(out)
    assert out.shape == (N, out_ch, H2, W2), out.shape
    assert bool(jnp.all(jnp.isfinite(out)))

    # Relative-error check (bf16 MXU operands vs f32 HIGHEST reference).
    ref = _reference_up(x1, x2, params)
    abs_err = float(jnp.max(jnp.abs(out - ref)))
    rel_err = abs_err / max(float(jnp.max(jnp.abs(ref))), 1e-6)
    assert rel_err < 5e-2, f"mismatch vs reference: rel err {rel_err} (abs {abs_err})"

    print("KERNEL_OK")
</pallas_src>

<mosaic_0001>
module attributes {stable_mosaic.version = 11 : i64} {
  func.func @_up_fused_kernel(%arg0: i32, %arg1: memref<1x8x32xf32, #tpu.memory_space<vmem>>, %arg2: memref<1x16x64xf32, #tpu.memory_space<vmem>>, %arg3: memref<48x8xf32, #tpu.memory_space<vmem>>, %arg4: memref<288x128xbf16, #tpu.memory_space<vmem>>, %arg5: memref<384x128xbf16, #tpu.memory_space<vmem>>, %arg6: memref<6x128xf32, #tpu.memory_space<vmem>>, %arg7: memref<1x16x128xf32, #tpu.memory_space<vmem>>) attributes {dimension_semantics = [#tpu.dimension_semantics<parallel>], iteration_bounds = array<i64: 2>, scalar_prefetch = 0 : i64, scratch_operands = 0 : i64, tpu.core_type = #tpu.core_type<tc>, window_params = [{transform_indices = @transform_0, window_bounds = array<i64: 1, 8, 32>}, {transform_indices = @transform_1, window_bounds = array<i64: 1, 16, 64>}, {pipeline_mode = #tpu.pipeline_mode<synchronous>, transform_indices = @transform_2, window_bounds = array<i64: 48, 8>}, {pipeline_mode = #tpu.pipeline_mode<synchronous>, transform_indices = @transform_3, window_bounds = array<i64: 288, 128>}, {pipeline_mode = #tpu.pipeline_mode<synchronous>, transform_indices = @transform_4, window_bounds = array<i64: 384, 128>}, {pipeline_mode = #tpu.pipeline_mode<synchronous>, transform_indices = @transform_5, window_bounds = array<i64: 6, 128>}, {transform_indices = @transform_6, window_bounds = array<i64: 1, 16, 128>}]} {
    %c0 = arith.constant 0 : index
    %c0_0 = arith.constant 0 : index
    %c0_1 = arith.constant 0 : index
    %0 = vector.load %arg1[%c0, %c0_0, %c0_1] : memref<1x8x32xf32, #tpu.memory_space<vmem>>, vector<1x8x32xf32>
    %1 = vector.shape_cast %0 : vector<1x8x32xf32> to vector<8x32xf32>
    %c0_2 = arith.constant 0 : index
    %c0_3 = arith.constant 0 : index
    %c0_4 = arith.constant 0 : index
    %2 = vector.load %arg2[%c0_2, %c0_3, %c0_4] : memref<1x16x64xf32, #tpu.memory_space<vmem>>, vector<1x16x64xf32>
    %3 = vector.shape_cast %2 : vector<1x16x64xf32> to vector<16x64xf32>
    %c0_5 = arith.constant 0 : index
    %c0_6 = arith.constant 0 : index
    %4 = vector.load %arg6[%c0_5, %c0_6] : memref<6x128xf32, #tpu.memory_space<vmem>>, vector<6x128xf32>
    %c0_7 = arith.constant 0 : index
    %c0_8 = arith.constant 0 : index
    %5 = vector.load %arg3[%c0_7, %c0_8] : memref<48x8xf32, #tpu.memory_space<vmem>>, vector<48x8xf32>
    %cst = arith.constant dense<0.000000e+00> : vector<48x32xf32>
    %6 = tpu.matmul %5, %1, %cst {dimension_numbers = #tpu.dot_dimension_numbers<[1], [0], [0], [1], [0, 0, 1, 1], [], []>} : vector<48x8xf32>, vector<8x32xf32>, vector<48x32xf32> -> vector<48x32xf32>
    %cst_9 = arith.constant 0.000000e+00 : f32
    %7 = vector.broadcast %cst_9 : f32 to vector<1x64xf32>
    %8 = vector.extract_strided_slice %3 {offsets = [0, 0], sizes = [15, 64], strides = [1, 1]} : vector<16x64xf32> to vector<15x64xf32>
    %9 = tpu.concatenate %7, %8 in 0 : vector<1x64xf32>, vector<15x64xf32> -> vector<16x64xf32>
    %10 = vector.extract_strided_slice %3 {offsets = [1, 0], sizes = [15, 64], strides = [1, 1]} : vector<16x64xf32> to vector<15x64xf32>
    %11 = tpu.concatenate %10, %7 in 0 : vector<15x64xf32>, vector<1x64xf32> -> vector<16x64xf32>
    %12 = vector.extract_strided_slice %6 {offsets = [0, 0], sizes = [16, 32], strides = [1, 1]} : vector<48x32xf32> to vector<16x32xf32>
    %13 = vector.extract_strided_slice %6 {offsets = [16, 0], sizes = [16, 32], strides = [1, 1]} : vector<48x32xf32> to vector<16x32xf32>
    %14 = vector.extract_strided_slice %6 {offsets = [32, 0], sizes = [16, 32], strides = [1, 1]} : vector<48x32xf32> to vector<16x32xf32>
    %15 = tpu.concatenate %9, %3, %11, %12, %13, %14 in 1 : vector<16x64xf32>, vector<16x64xf32>, vector<16x64xf32>, vector<16x32xf32>, vector<16x32xf32>, vector<16x32xf32> -> vector<16x288xf32>
    %16 = arith.truncf %15 : vector<16x288xf32> to vector<16x288xbf16>
    %c0_10 = arith.constant 0 : index
    %c0_11 = arith.constant 0 : index
    %17 = vector.load %arg4[%c0_10, %c0_11] : memref<288x128xbf16, #tpu.memory_space<vmem>>, vector<288x128xbf16>
    %cst_12 = arith.constant dense<0.000000e+00> : vector<16x128xf32>
    %18 = tpu.matmul %16, %17, %cst_12 {dimension_numbers = #tpu.dot_dimension_numbers<[1], [0], [0], [1], [0, 0, 1, 1], [], []>} : vector<16x288xbf16>, vector<288x128xbf16>, vector<16x128xf32> -> vector<16x128xf32>
    %19 = vector.extract_strided_slice %4 {offsets = [0, 0], sizes = [1, 128], strides = [1, 1]} : vector<6x128xf32> to vector<1x128xf32>
    %20 = vector.broadcast %19 : vector<1x128xf32> to vector<16x128xf32>
    %21 = arith.addf %18, %20 : vector<16x128xf32>
    %cst_13 = arith.constant 0.000000e+00 : f32
    %22 = vector.broadcast %cst_13 : f32 to vector<16x128xf32>
    %23 = arith.maximumf %21, %22 : vector<16x128xf32>
    %24 = vector.extract_strided_slice %4 {offsets = [1, 0], sizes = [1, 128], strides = [1, 1]} : vector<6x128xf32> to vector<1x128xf32>
    %25 = vector.broadcast %24 : vector<1x128xf32> to vector<16x128xf32>
    %26 = arith.mulf %23, %25 : vector<16x128xf32>
    %27 = vector.extract_strided_slice %4 {offsets = [2, 0], sizes = [1, 128], strides = [1, 1]} : vector<6x128xf32> to vector<1x128xf32>
    %28 = vector.broadcast %27 : vector<1x128xf32> to vector<16x128xf32>
    %29 = arith.addf %26, %28 : vector<16x128xf32>
    %cst_14 = arith.constant 0.000000e+00 : f32
    %30 = vector.broadcast %cst_14 : f32 to vector<1x128xf32>
    %31 = vector.extract_strided_slice %29 {offsets = [0, 0], sizes = [15, 128], strides = [1, 1]} : vector<16x128xf32> to vector<15x128xf32>
    %32 = tpu.concatenate %30, %31 in 0 : vector<1x128xf32>, vector<15x128xf32> -> vector<16x128xf32>
    %33 = vector.extract_strided_slice %29 {offsets = [1, 0], sizes = [15, 128], strides = [1, 1]} : vector<16x128xf32> to vector<15x128xf32>
    %34 = tpu.concatenate %33, %30 in 0 : vector<15x128xf32>, vector<1x128xf32> -> vector<16x128xf32>
    %35 = tpu.concatenate %32, %29, %34 in 1 : vector<16x128xf32>, vector<16x128xf32>, vector<16x128xf32> -> vector<16x384xf32>
    %36 = arith.truncf %35 : vector<16x384xf32> to vector<16x384xbf16>
    %c0_15 = arith.constant 0 : index
    %c0_16 = arith.constant 0 : index
    %37 = vector.load %arg5[%c0_15, %c0_16] : memref<384x128xbf16, #tpu.memory_space<vmem>>, vector<384x128xbf16>
    %cst_17 = arith.constant dense<0.000000e+00> : vector<16x128xf32>
    %38 = tpu.matmul %36, %37, %cst_17 {dimension_numbers = #tpu.dot_dimension_numbers<[1], [0], [0], [1], [0, 0, 1, 1], [], []>} : vector<16x384xbf16>, vector<384x128xbf16>, vector<16x128xf32> -> vector<16x128xf32>
    %39 = vector.extract_strided_slice %4 {offsets = [3, 0], sizes = [1, 128], strides = [1, 1]} : vector<6x128xf32> to vector<1x128xf32>
    %40 = vector.broadcast %39 : vector<1x128xf32> to vector<16x128xf32>
    %41 = arith.addf %38, %40 : vector<16x128xf32>
    %cst_18 = arith.constant 0.000000e+00 : f32
    %42 = vector.broadcast %cst_18 : f32 to vector<16x128xf32>
    %43 = arith.maximumf %41, %42 : vector<16x128xf32>
    %44 = vector.extract_strided_slice %4 {offsets = [4, 0], sizes = [1, 128], strides = [1, 1]} : vector<6x128xf32> to vector<1x128xf32>
    %45 = vector.broadcast %44 : vector<1x128xf32> to vector<16x128xf32>
    %46 = arith.mulf %43, %45 : vector<16x128xf32>
    %47 = vector.extract_strided_slice %4 {offsets = [5, 0], sizes = [1, 128], strides = [1, 1]} : vector<6x128xf32> to vector<1x128xf32>
    %48 = vector.broadcast %47 : vector<1x128xf32> to vector<16x128xf32>
    %49 = arith.addf %46, %48 : vector<16x128xf32>
    %50 = vector.shape_cast %49 : vector<16x128xf32> to vector<1x16x128xf32>
    %c0_19 = arith.constant 0 : index
    %c0_20 = arith.constant 0 : index
    %c0_21 = arith.constant 0 : index
    %51 = vector.load %arg7[%c0_19, %c0_20, %c0_21] : memref<1x16x128xf32, #tpu.memory_space<vmem>>, vector<1x16x128xf32>
    tpu.vector_store %arg7[%c0_19, %c0_20, %c0_21], %50 {strides = array<i32>} : memref<1x16x128xf32, #tpu.memory_space<vmem>>, vector<1x16x128xf32>,
    return
  }
  func.func @transform_0(%arg0: i32) -> (i32, i32, i32) {
    %c0_i32 = arith.constant 0 : i32
    %c0_i32_0 = arith.constant 0 : i32
    %c0_i32_1 = arith.constant 0 : i32
    return %arg0, %c0_i32, %c0_i32_0 : i32, i32, i32
  }
  func.func @transform_1(%arg0: i32) -> (i32, i32, i32) {
    %c0_i32 = arith.constant 0 : i32
    %c0_i32_0 = arith.constant 0 : i32
    %c0_i32_1 = arith.constant 0 : i32
    return %arg0, %c0_i32, %c0_i32_0 : i32, i32, i32
  }
  func.func @transform_2(%arg0: i32) -> (i32, i32) {
    %c0_i32 = arith.constant 0 : i32
    %c0_i32_0 = arith.constant 0 : i32
    %c0_i32_1 = arith.constant 0 : i32
    return %c0_i32, %c0_i32_0 : i32, i32
  }
  func.func @transform_3(%arg0: i32) -> (i32, i32) {
    %c0_i32 = arith.constant 0 : i32
    %c0_i32_0 = arith.constant 0 : i32
    %c0_i32_1 = arith.constant 0 : i32
    return %c0_i32, %c0_i32_0 : i32, i32
  }
  func.func @transform_4(%arg0: i32) -> (i32, i32) {
    %c0_i32 = arith.constant 0 : i32
    %c0_i32_0 = arith.constant 0 : i32
    %c0_i32_1 = arith.constant 0 : i32
    return %c0_i32, %c0_i32_0 : i32, i32
  }
  func.func @transform_5(%arg0: i32) -> (i32, i32) {
    %c0_i32 = arith.constant 0 : i32
    %c0_i32_0 = arith.constant 0 : i32
    %c0_i32_1 = arith.constant 0 : i32
    return %c0_i32, %c0_i32_0 : i32, i32
  }
  func.func @transform_6(%arg0: i32) -> (i32, i32, i32) {
    %c0_i32 = arith.constant 0 : i32
    %c0_i32_0 = arith.constant 0 : i32
    %c0_i32_1 = arith.constant 0 : i32
    return %arg0, %c0_i32, %c0_i32_0 : i32, i32, i32
  }
}

</mosaic_0001>

<bundles_post_ra>
// kernel: tpu_custom_call.1
= control target key start
LH: loop header
LB: loop body
LE: loop exit
PB: predicated region body
PF: predicated region fallthrough
CT: control target
= control target key end

     0   :  { %11 = vsyncpa [#allocation3], 0  ;;  %s1812_s0 = inlined_call_operand.vmem [shape: f32[2,8,32], index: 0, kind: input, shape index: {}]   ;;  %s1813_s1 = inlined_call_operand.vmem [shape: f32[2,16,64], index: 1, kind: input, shape index: {}]   ;;  %s1814_s2 = inlined_call_operand.vmem [shape: f32[48,8], index: 2, kind: input, shape index: {}]   ;;  %s1815_s3 = inlined_call_operand.hbm [shape: bf16[288,128], index: 3, kind: input, shape index: {}]   ;;  %s1816_s4 = inlined_call_operand.hbm [shape: bf16[384,128], index: 4, kind: input, shape index: {}]   ;;  %s1817_s5 = inlined_call_operand.vmem [shape: f32[6,128], index: 5, kind: input, shape index: {}]   ;;  %s1818_s6 = inlined_call_operand.hbm [shape: f32[2,16,128], index: 6, kind: output, shape index: {}]  }
   0x1   :  { %12 = vsyncpa [#allocation6], 0 }
   0x2   :  { %13 = vsyncpa [#allocation4], 0 }
   0x3   :  { %15 = vsyncpa [#allocation4 + $0x1], 0  ;;  %s1612_s21 = smov 0   ;;  %s1614_s22 = smov 0  }
   0x4   :  { %s1616_s23 = smov 0   ;;  %s1618_s24 = smov 0  }
   0x5 LB: > { %s1633_s25 = sadd.s32 4294967295, %s1563_s24   ;;  %s1140_s26 = sadd.s32 4294967294, %s1563_s24   ;;  %s1563_s24 = sphi %s1618_s24, %s1832_s24   ;;  %s1559_s23 = sphi %s1616_s23, %s1831_s23   ;;  %s1555_s22 = sphi %s1614_s22, %s1830_s22   ;;  %s1551_s21 = sphi %s1612_s21, %s1829_s21  }
   0x6   : > { %s1637_s27 = sadd.s32 1, %s1563_s24   ;;  %s164_s28 = sadd.s32 1, %s1559_s23 }
   0x7   : > { %s161_s29 = ssub.s32 %s1563_s24, %s1637_s27  ;;  %p174_p0 = scmp.ne.s32.totalorder %s1559_s23, %s1555_s22 }
   0x8   : > { %p162_p1 = scmp.eq.s32.totalorder %s161_s29, 0  ;;  %p175_p2 = scmp.eq.s32.totalorder %s1633_s25, 1 }
   0x9   : > { %p180_p3 = scmp.ne.s32.totalorder %s1555_s22, %s1551_s21  ;;  %p181_p4 = scmp.eq.s32.totalorder %s1140_s26, 1 }
   0xa   : > { %s1648_s30 = scalar_select %p162_p1, %s1559_s23, %s164_s28  }
   0xb   : > { %p1650_p5 = por %p175_p2, %p174_p0  ;;  %p1654_p6 = por %p181_p4, %p180_p3 }
   0xc   : > { %p1141_p7 = scmp.ge.s32.totalorder %s1563_s24, 1  ;;  %p188_p8 = scmp.lt.s32.totalorder %s1563_s24, 3 }
   0xd   : > { %s1821_s8 = scalar_select %p1654_p6, 1, 0 }
   0xe   : > { %p1819_p9 = scmp.eq.s32.totalorder %s1633_s25, 0  ;;  %p1661_p10 = pnand %p1141_p7, %p188_p8 }
   0xf   : > { %s1565_s10 = smov [#allocation2]   ;;  %s1566_s13 = smov [#allocation5]  }
  0x10   : > { %s203_s11 = sshll.u32 %s1565_s10, 4  ;;  %p1327_p11 = pneg %p1661_p10  ;;  %s204_s11 = int_to_ptr.vmem [resolvable:$true] %s203_s11 }
  0x11   : > { %s216_s14 = sshll.u32 %s1566_s13, 4  ;;  %s1454_s15 = scalar_lea.vmem %s204_s11, 2304  ;;  %s217_s14 = int_to_ptr.vmem [resolvable:$true] %s216_s14 }
  0x12   : > { %p1669_p12 = pnand %p1819_p9, %p1327_p11  ;;  %p1455_p0 = scmp.ne.s32.totalorder %s204_s11, %s1454_s15 }
  0x13   : > { %p1462_p3 = scmp.lt.s32.totalorder %s204_s11, %s204_s11  ;;  %p1463_p4 = scmp.lt.s32.totalorder %s1454_s15, %s1454_s15 }
  0x14   : > { %p1445_p13 = pneg %p1669_p12 }
  0x15   : > { %p1464_p7 = por %p1463_p4, %p1462_p3 }
  0x16   : > { %p1457_p1 = pnand %p1455_p0, %p1445_p13 }
  0x18   : > { %p1458_p2 = pneg %p1457_p1 }
  0x1a   : > { %p1465_p8 = pnand %p1464_p7, %p1458_p2 }
  0x1c   : > { %1468 = shalt.err (!%p1465_p8)
}
  0x1d   : > { %s1567_s16 = smov 64   ;;  %s1568_s17 = smov 4  }
  0x1e   : > { %1330 = dma.hbm_to_vmem [thread:$0]  (!%p1669_p12), %s1815_s3, 2304, %s204_s11, [#allocation3], %s1567_s16, %s1567_s16, %s1568_s17  }
  0x1f   : > { %s1480_s20 = scalar_lea.vmem %s217_s14, 3072  ;;  %p1488_p9 = scmp.lt.s32.totalorder %s217_s14, %s217_s14 }
  0x20   : > { %p1481_p11 = scmp.ne.s32.totalorder %s217_s14, %s1480_s20  ;;  %p1489_p6 = scmp.lt.s32.totalorder %s1480_s20, %s1480_s20 }
  0x22   : > { %p1483_p0 = pnand %p1481_p11, %p1445_p13  ;;  %p1490_p3 = por %p1489_p6, %p1488_p9 }
  0x24   : > { %p1484_p1 = pneg %p1483_p0 }
  0x26   : > { %p1491_p2 = pnand %p1490_p3, %p1484_p1 }
  0x28   : > { %1494 = shalt.err (!%p1491_p2)
}
  0x29   : > { %1333 = dma.hbm_to_vmem [thread:$0]  (!%p1669_p12), %s1816_s4, 3072, %s217_s14, [#allocation6], %s1567_s16, %s1567_s16, %s1568_s17  }
  0x2a   : > { %250 = sbr.rel (%p1661_p10) target bundleno = 823 (0x337), region = 44  ;;  %p1824_p4 = scmp.eq.s32.totalorder (!%p1661_p10), %s1633_s25, 0 }
  0x2f   : > { %1538 = dma.done.wait (%p1824_p4), [#allocation3], 2304   ;;  %p1825_p13 = pmov %p1824_p4 }
  0x30   : > { %p1826_p7 = pmov %p1824_p4 }
  0x31   : > { %1540 = vsyncadd (%p1825_p13), [#allocation3], 4294964992 }
  0x32   : > { %1542 = dma.done.wait (%p1826_p7), [#allocation6], 3072   ;;  %p1827_p6 = pmov %p1824_p4 }
  0x33   : > { %p288_p9 = scmp.lt.s32.totalorder %s1633_s25, 1  ;;  %vm308_vm0 = vcmask 64512   ;;  %v302_v1 = vld [vmem:[%s1814_s2] sm:$0xff]  ;;  %v303_v2 = vld [vmem:[%s1814_s2 + $0x8] sm:$0xff]  ;;  %v304_v3 = vld [vmem:[%s1814_s2 + $0x10] sm:$0xff]  ;;  %s1569_s15 = smov 64  }
  0x34   : > { %1544 = vsyncadd (%p1827_p6), [#allocation6], 4294964224  ;;  %1280 = vmatprep.mubr.msk.f32.mxu0 %vm308_vm0, %v302_v1  ;;  %v305_v4 = vld [vmem:[%s1814_s2 + $0x18] sm:$0xff]  ;;  %v306_v5 = vld [vmem:[%s1814_s2 + $0x20] sm:$0xff]  ;;  %v1570_v25 = vmov 0.0   ;;  %vm431_vm1 = vcmask 1046528  }
  0x35   : > { %s289_s29 = scalar_select %p288_p9, %s1633_s25, 1  ;;  %v307_v6 = vld [vmem:[%s1814_s2 + $0x28] sm:$0xff]  ;;  %v1401_v10 = vld [vmem:[#allocation2 + $0x78] sm:$0xff]   ;;  %v1403_v12 = vld [vmem:[#allocation2 + $0x70] sm:$0xff]   ;;  %vm1571_vm2 = vmmov 0   ;;  %vm424_vm3 = vcmask 1040384  }
  0x36   : > { %v1402_v11 = vld [vmem:[#allocation2 + $0x38] sm:$0xff]   ;;  %1222 = vmatprep.subr.bf16.mxu1 %v1401_v10  ;;  %v1404_v13 = vld [vmem:[#allocation2 + $0x30] sm:$0xff]   ;;  %v1405_v14 = vld [vmem:[#allocation2 + $0x68] sm:$0xff]   ;;  %vm460_vm4 = vcmask 523264   ;;  %vm619_vm5 = vcmask 261120   ;;  %vm465_vm6 = vcmask 785408  }
  0x37   : > { %s1149_s10 = sshll.u32 %s289_s29, 3  ;;  %s1213_s9 = sshll.u32 %s289_s29, 4  ;;  %1223 = vmatpush3.bf16.msra.mxu1 %v1402_v11  ;;  %v1406_v15 = vld [vmem:[#allocation2 + $0x28] sm:$0xff]   ;;  %v1407_v16 = vld [vmem:[#allocation2 + $0x60] sm:$0xff]   ;;  %v1409_v18 = vld [vmem:[#allocation2 + $0x58] sm:$0xff]   ;;  %vm1573_vm8 = vmmov 1  }
  0x38   : > { %s291_s12 = scalar_lea.vmem %s1812_s0, %s1149_s10  ;;  %s296_s14 = scalar_lea.vmem %s1813_s1, %s1213_s9  ;;  %1224 = vmatprep.subr.bf16.mxu1 %v1403_v12  ;;  %v1408_v17 = vld [vmem:[#allocation2 + $0x20] sm:$0xff]   ;;  %v1410_v19 = vld [vmem:[#allocation2 + $0x18] sm:$0xff]   ;;  %v1411_v20 = vld [vmem:[#allocation2 + $0x50] sm:$0xff]  }
  0x39   : > { %v298_v0 = vld [vmem:[%s291_s12] sm:$0xff]  ;;  %v1727_v8 = vld [vmem:[%s296_s14 + $0x8] sm:$0xff]  ;;  %v1412_v21 = vld [vmem:[#allocation2 + $0x10] sm:$0xff]   ;;  %s1572_s29 = smov 96   ;;  %s285_s18 = sand.u32 1, %s1555_s22  }
  0x3a   : > { %1278 = vmatprep.subr.mxu0 %v298_v0  ;;  %v299_v7 = vld [vmem:[%s296_s14] sm:$0xff]  ;;  %v433_v22 = vrot.slane %v1727_v8, 1  ;;  %v1413_v24 = vld [vmem:[#allocation2 + $0x88] sm:$0xff]   ;;  %v426_v29 = vrot.slane %v1727_v8, 7  ;;  %v1430_v10 = vld [vmem:[#allocation5 + $0xa0] sm:$0xff]   ;;  %s1148_s19 = sshll.u32 %s285_s18, 4 }
  0x3b   : > { %1279 = vmatpush3.msra.mxu0 %v298_v0  ;;  %v1396_v9 = vpack.i.bf16 %v1727_v8, %v299_v7  ;;  %1225 = vmatpush3.bf16.msra.mxu1 %v1404_v13  ;;  %v432_v23 = vrot.slane %v299_v7, 1  ;;  %v1414_v26 = vld [vmem:[#allocation2 + $0x48] sm:$0xff]   ;;  %v425_v30 = vrot.slane %v299_v7, 7  ;;  %v1416_v31 = vld [vmem:[#allocation2 + $0x80] sm:$0xff]   ;;  %v1427_v7 = vld [vmem:[#allocation5 + $0xa8] sm:$0xff]   ;;  %s1214_s20 = sshll.u32 %s1633_s25, 8 }
  0x3c   : > { %1281 = vmatmul.mubr.msk.f32.vlgmr.msra.gmra.mxu0 %vm308_vm0, %v303_v2  ;;  %1226 = vmatprep.subr.bf16.mxu1 %v1405_v14  ;;  %v1415_v27 = vld [vmem:[#allocation2 + $0x8] sm:$0xff]   ;;  %v1417_v33 = vld [vmem:[#allocation2 + $0x40] sm:$0xff]   ;;  %v437_v58 = vsel %vm431_vm1, %v433_v22, 0.0  ;;  %v1428_v8 = vld [vmem:[#allocation5 + $0x60] sm:$0xff]   ;;  %s287_s26 = scalar_lea.vmem [#allocation7], %s1148_s19  ;;  %s1768_s9 = scalar_lea.hbm %s1818_s6, %s1214_s20 }
  0x3d   : > { %1283 = vmatprep.mubr.msk.f32.mxu0 %vm308_vm0, %v304_v3  ;;  %1397 = vrot.lane.b32.xlu1 %v1396_v9, %s1569_s15  ;;  %v434_v28 = vsel %vm431_vm1, %v432_v23, %v433_v22  ;;  %v1418_v34 = vld [vmem:[#allocation2] sm:$0xff]   ;;  %v427_v37 = vsel %vm424_vm3, %v425_v30, %v426_v29  ;;  %v430_v38 = vsel %vm424_vm3, 0.0, %v425_v30  ;;  %v1419_v44 = vld [vmem:[#allocation5 + $0x78] sm:$0xff]   ;;  %v1429_v9 = vld [vmem:[#allocation5 + $0x20] sm:$0xff]   ;;  %s1044_s28 = sshll.u32 %s287_s26, 4  ;;  %s1772_s12 = scalar_lea.sflag [#allocation4], %s285_s18  ;;  %s1770_s28 = int_to_ptr.vmem [resolvable:$true] %s1044_s28 }
  0x3e   : > { %1289 = vmatprep.subr.bf16.mxu0 %v1570_v25  ;;  %v1420_v51 = vld [vmem:[#allocation5 + $0x38] sm:$0xff]   ;;  %v1422_v53 = vld [vmem:[#allocation5 + $0x70] sm:$0xff]   ;;  %v1439_v22 = vld [vmem:[#allocation5 + $0x88] sm:$0xff]   ;;  %s1495_s13 = scalar_lea.vmem %s1770_s28, 256  ;;  %s1574_s25 = smov [#allocation7]  }
  0x3f   : > { %1227 = vmatpush3.bf16.msra.mxu1 %v1406_v15  ;;  %1290 = vmatpush3.bf16.msra.mxu0 %v1413_v24  ;;  %v1423_v54 = vld [vmem:[#allocation5 + $0x30] sm:$0xff]   ;;  %v1421_v3 = vld [vmem:[#allocation5 + $0xb8] sm:$0xff]   ;;  %v1440_v23 = vld [vmem:[#allocation5 + $0x40] sm:$0xff]   ;;  %p1496_p10 = scmp.ne.s32.totalorder %s1770_s28, %s1495_s13  ;;  %s1499_s14 = sshll.u32 %s1574_s25, 4  ;;  %s1500_s14 = int_to_ptr.vmem [resolvable:$false] %s1499_s14 }
  0x40   : > { %1284 = vmatmul.mubr.msk.f32.gmra.mxu0 %vm308_vm0, %v305_v4  ;;  %1228 = vmatprep.subr.bf16.mxu1 %v1407_v16  ;;  %v1424_v4 = vld [vmem:[#allocation5 + $0xb0] sm:$0xff]   ;;  %v1431_v11 = vld [vmem:[#allocation5 + $0x58] sm:$0xff]   ;;  %vm1201_vm7 = vmneg %vm424_vm3  ;;  %p1502_p11 = scmp.lt.s32.totalorder %s1770_s28, %s1500_s14 }
  0x41   : > { %1286 = vmatprep.mubr.msk.f32.mxu0 %vm308_vm0, %v306_v5  ;;  %1291 = vmatprep.subr.bf16.mxu0 %v1570_v25  ;;  %v1425_v5 = vld [vmem:[#allocation5 + $0x68] sm:$0xff]   ;;  %v1432_v12 = vld [vmem:[#allocation5 + $0x18] sm:$0xff]   ;;  %v1434_v14 = vld [vmem:[#allocation5 + $0x50] sm:$0xff]   ;;  %p1497_p12 = pnand %p1496_p10, %p1650_p5 }
  0x42   : > { %v1433_v13 = vld [vmem:[#allocation5 + $0x98] sm:$0xff]   ;;  %v1435_v16 = vld [vmem:[#allocation5 + $0x10] sm:$0xff]   ;;  %vm1202_vm9 = vmpackc.low %vm1573_vm8, %vm1201_vm7 }
  0x43   : > { %1229 = vmatpush3.bf16.msra.mxu1 %v1408_v17  ;;  %1292 = vmatpush3.bf16.msra.mxu0 %v1416_v31  ;;  %v1436_v17 = vld [vmem:[#allocation5 + $0x90] sm:$0xff]   ;;  %vm1205_vm10 = vmpackc.low %vm431_vm1, %vm1573_vm8  ;;  %p1498_p8 = pneg %p1497_p12 }
  0x44   : > { %1287 = vmatmul.mubr.msk.f32.gmra.mxu0 %vm308_vm0, %v307_v6  ;;  %1230 = vmatprep.subr.bf16.mxu1 %v1409_v18  ;;  %v1426_v6 = vld [vmem:[#allocation5 + $0x28] sm:$0xff]   ;;  %v301_v31 = vld [vmem:[%s1817_s5] sm:$0x3f] }
  0x45   : > { %1293 = vmatprep.mubr.msk.bf16.mxu0 %vm1571_vm2, %v1570_v25  ;;  %1247 = vmatprep.subr.bf16.mxu0 %v1419_v44 }
  0x47   : > { %1231 = vmatpush3.bf16.msra.mxu1 %v1410_v19  ;;  %v1437_v19 = vld [vmem:[#allocation5 + $0x48] sm:$0xff]  }
  0x48   : > { %1232 = vmatprep.subr.bf16.mxu1 %v1411_v20 }
  0x4b   : > { %1233 = vmatpush3.bf16.msra.mxu1 %v1412_v21  ;;  %v1438_v21 = vld [vmem:[#allocation5 + $0x8] sm:$0xff]  }
  0x4c   : > { %1234 = vmatprep.subr.bf16.mxu1 %v1414_v26  ;;  %v1441_v26 = vld [vmem:[#allocation5] sm:$0xff]  }
  0x4f   : > { %1235 = vmatpush3.bf16.msra.mxu1 %v1415_v27  ;;  %v1442_v27 = vld [vmem:[#allocation5 + $0x80] sm:$0xff]  }
  0x50   : > { %1236 = vmatprep.subr.bf16.mxu1 %v1417_v33 }
  0x53   : > { %1237 = vmatpush3.bf16.msra.mxu1 %v1418_v34 }
  0x54   : > { %1297 = vmatprep.subr.bf16.mxu1 %v1570_v25 }
  0xaf   : > { %v1398_v32 = vpop.permute.xlu1 %1397 }
  0xb0   : > { %v1400_v35 = vunpack.i.h.bf16 %v1398_v32  ;;  %v1399_v36 = vunpack.i.l.bf16 %v1398_v32 }
  0xb2   : > { %v461_v39 = vsel %vm460_vm4, %v430_v38, %v1399_v36  ;;  %v462_v40 = vsel %vm460_vm4, %v427_v37, %v1400_v35 }
  0xb3   : > { %v468_v42 = vpack.c.bf16 %v462_v40, %v461_v39 }
  0xfc   : > { %v1282_v41 = vpop.f32.mrf.mxu0 }
  0xfe   : > { %v393_v43 = vpop.f32.mrf.mxu0 }
  0xff   : > { %v1386_v45 = vpack.i.bf16 %v1282_v41, %v393_v43 }
 0x100   : > { %v1285_v46 = vpop.f32.mrf.mxu0 }
 0x101   : > { %1387 = vrot.lane.b32.xlu0 %v1386_v45, %s1569_s15  ;;  %s1501_s15 = scalar_lea.vmem %s1500_s14, 512 }
 0x102   : > { %v403_v47 = vpop.f32.mrf.mxu0  ;;  %p1503_p0 = scmp.lt.s32.totalorder %s1501_s15, %s1495_s13 }
 0x103   : > { %v1391_v48 = vpack.i.bf16 %v1285_v46, %v403_v47 }
 0x104   : > { %v1288_v49 = vpop.f32.mrf.mxu0  ;;  %p1504_p1 = por %p1503_p0, %p1502_p11 }
 0x105   : > { %1392 = vrot.lane.b32.xlu0 %v1391_v48, %s1572_s29 }
 0x106   : > { %v413_v50 = vpop.f32.mrf.mxu0  ;;  %p1505_p3 = pnand %p1504_p1, %p1498_p8 }
 0x107   : > { %v470_v52 = vpack.c.bf16 %v1288_v49, %v413_v50 }
 0x109   : > { %1294 = vmatmul.mubr.msk.bf16.vlgmr.msra.gmra.mxu0 %vm619_vm5, %v470_v52 }
 0x10a   : > { %1248 = vmatpush3.bf16.msra.mxu0 %v1420_v51 }
 0x10b   : > { %1249 = vmatprep.subr.bf16.mxu0 %v1422_v53 }
 0x10e   : > { %1250 = vmatpush3.bf16.msra.mxu0 %v1423_v54 }
 0x10f   : > { %1251 = vmatprep.subr.bf16.mxu0 %v1425_v5 }
 0x112   : > { %1252 = vmatpush3.bf16.msra.mxu0 %v1426_v6 }
 0x113   : > { %1253 = vmatprep.subr.bf16.mxu0 %v1428_v8 }
 0x116   : > { %1254 = vmatpush3.bf16.msra.mxu0 %v1429_v9 }
 0x117   : > { %1255 = vmatprep.subr.bf16.mxu0 %v1431_v11 }
 0x11a   : > { %1256 = vmatpush3.bf16.msra.mxu0 %v1432_v12 }
 0x11b   : > { %1257 = vmatprep.subr.bf16.mxu0 %v1434_v14 }
 0x11e   : > { %1258 = vmatpush3.bf16.msra.mxu0 %v1435_v16 }
 0x11f   : > { %1259 = vmatprep.subr.bf16.mxu0 %v1437_v19 }
 0x122   : > { %1260 = vmatpush3.bf16.msra.mxu0 %v1438_v21 }
 0x123   : > { %1261 = vmatprep.subr.bf16.mxu0 %v1440_v23 }
 0x126   : > { %1262 = vmatpush3.bf16.msra.mxu0 %v1441_v26 }
 0x173   : > { %v1388_v55 = vpop.permute.xlu0 %1387 }
 0x174   : > { %v1390_v56 = vunpack.i.h.bf16 %v1388_v55  ;;  %v1389_v57 = vunpack.i.l.bf16 %v1388_v55 }
 0x176   : > { %v463_v62 = vsel %vm460_vm4, %v434_v28, %v1389_v57  ;;  %v464_v63 = vsel %vm460_vm4, %v437_v58, %v1390_v56  ;;  %v507_v28 = vlaneseq }
 0x177   : > { %v1393_v59 = vpop.permute.xlu0 %1392 }
 0x178   : > { %v1395_v60 = vunpack.i.h.bf16 %v1393_v59  ;;  %v1394_v61 = vunpack.i.l.bf16 %v1393_v59  ;;  %v508_v29 = vshrl.u32 %v507_v28, 7 }
 0x17a   : > { %v466_v0 = vsel %vm465_vm6, %v463_v62, %v1394_v61  ;;  %v467_v1 = vsel %vm465_vm6, %v464_v63, %v1395_v60  ;;  %v509_v30 = vsub.s32 0, %v508_v29  ;;  %v709_v36 = vsub.s32 1, %v508_v29 }
 0x17b   : > { %v469_v2 = vpack.c.bf16 %v467_v1, %v466_v0  ;;  %v715_v40 = vsub.s32 2, %v508_v29  ;;  %v786_v61 = vsub.s32 3, %v508_v29  ;;  %v1024_v8 = vsub.s32 5, %v508_v29 }
 0x17c   : > { %v510_v33 = vrot.slane %v301_v31, %v509_v30  ;;  %v710_v41 = vrot.slane %v301_v31, %v709_v36 }
 0x17d   : > { %655 = vmatprep.mubr.bf16.mxu1 %v469_v2  ;;  %v716_v45 = vrot.slane %v301_v31, %v715_v40  ;;  %v787_v0 = vrot.slane %v301_v31, %v786_v61 }
 0x17e   : > { %656 = vmatmul.mubr.bf16.vlgmr.msra.gmra.mxu1 %v468_v42 }
 0x17f   : > { %1298 = vmatpush3.bf16.msra.mxu1 %v1421_v3  ;;  %1313 = vmatprep.mubr.msk.bf16.mxu1 %vm1571_vm2, %v1570_v25 }
 0x180   : > { %1299 = vmatprep.subr.bf16.mxu1 %v1570_v25 }
 0x183   : > { %1300 = vmatpush3.bf16.msra.mxu1 %v1424_v4  ;;  %v1018_v4 = vsub.s32 4, %v508_v29 }
 0x184   : > { %1301 = vmatprep.subr.bf16.mxu1 %v1570_v25 }
 0x185   : > { %v1019_v12 = vrot.slane %v301_v31, %v1018_v4 }
 0x187   : > { %1302 = vmatpush3.bf16.msra.mxu1 %v1427_v7 }
 0x188   : > { %1303 = vmatprep.subr.bf16.mxu1 %v1570_v25 }
 0x18b   : > { %1304 = vmatpush3.bf16.msra.mxu1 %v1430_v10 }
 0x18c   : > { %1305 = vmatprep.subr.bf16.mxu1 %v1570_v25 }
 0x18f   : > { %1306 = vmatpush3.bf16.msra.mxu1 %v1433_v13 }
 0x190   : > { %1307 = vmatprep.subr.bf16.mxu1 %v1570_v25 }
 0x193   : > { %1308 = vmatpush3.bf16.msra.mxu1 %v1436_v17 }
 0x194   : > { %1309 = vmatprep.subr.bf16.mxu1 %v1570_v25 }
 0x197   : > { %1310 = vmatpush3.bf16.msra.mxu1 %v1439_v22 }
 0x198   : > { %1311 = vmatprep.subr.bf16.mxu1 %v1570_v25 }
 0x19b   : > { %1312 = vmatpush3.bf16.msra.mxu1 %v1442_v27 }
 0x1c9   : > { %v698_v15 = vpop.f32.mrf.mxu0 }
 0x1cb   : > { %v1295_v18 = vpop.f32.mrf.mxu0 }
 0x1cd   : > { %v701_v20 = vpop.f32.mrf.mxu0 }
 0x1cf   : > { %v1296_v24 = vpop.f32.mrf.mxu0 }
 0x23e   : > { %v1238_v32 = vpop.f32.mrf.mxu1 }
 0x240   : > { %v1239_v34 = vpop.f32.mrf.mxu1 }
 0x241   : > { %v1240_v35 = vadd.f32 %v1239_v34, %v1238_v32 }
 0x242   : > { %v1241_v37 = vpop.f32.mrf.mxu1 }
 0x243   : > { %v658_v38 = vadd.f32 %v1240_v35, %v510_v33 }
 0x244   : > { %v1242_v39 = vpop.f32.mrf.mxu1 }
 0x245   : > { %v699_v25 = vadd.f32 %v698_v15, %v658_v38  ;;  %v1243_v42 = vadd.f32 %v1242_v39, %v1241_v37  ;;  %v1025_v15 = vrot.slane %v301_v31, %v1024_v8 }
 0x247   : > { %v705_v43 = vmax.f32 %v699_v25, 0.0  ;;  %v661_v44 = vadd.f32 %v1243_v42, %v510_v33 }
 0x249   : > { %v711_v46 = vmul.f32 %v710_v41, %v705_v43  ;;  %v702_v47 = vadd.f32 %v701_v20, %v661_v44 }
 0x24b   : > { %v706_v48 = vmax.f32 %v702_v47, 0.0  ;;  %v717_v49 = vadd.f32 %v716_v45, %v711_v46 }
 0x24d   : > { %v712_v50 = vmul.f32 %v710_v41, %v706_v48  ;;  %v721_v52 = vrot.slane %v717_v49, 7  ;;  %v727_v54 = vrot.slane %v717_v49, 1 }
 0x24f   : > { %v718_v51 = vadd.f32 %v716_v45, %v712_v50 }
 0x251   : > { %v722_v53 = vrot.slane %v718_v51, 7  ;;  %v728_v55 = vrot.slane %v718_v51, 1  ;;  %v734_v56 = vpack.c.bf16 %v718_v51, %v717_v49 }
 0x253   : > { %964 = vmatprep.mubr.bf16.mxu0 %v734_v56  ;;  %v723_v57 = vsel %vm424_vm3, %v721_v52, %v722_v53  ;;  %v729_v58 = vsel %vm431_vm1, %v727_v54, %v728_v55 }
 0x254   : > { %v1203_v59 = vpack.c.bf16 %v723_v57, %v721_v52  ;;  %v1206_v60 = vpack.c.bf16 %v728_v55, %v729_v58 }
 0x256   : > { %1204 = vmatmul.mubr.msk.bf16.vlgmr.msra.gmra.mxu0 %vm1202_vm9, %v1203_v59  ;;  %1314 = vmatmul.mubr.msk.bf16.vlgmr.msra.gmra.mxu1 %vm1205_vm10, %v1206_v60 }
 0x316   : > { %v1263_v62 = vpop.f32.mrf.mxu0  ;;  %v1007_v63 = vpop.f32.mrf.mxu1 }
 0x318   : > { %v1264_v1 = vpop.f32.mrf.mxu0  ;;  %v1315_v2 = vpop.f32.mrf.mxu1 }
 0x319   : > { %v1265_v3 = vadd.f32 %v1264_v1, %v1263_v62 }
 0x31a   : > { %v1266_v5 = vpop.f32.mrf.mxu0  ;;  %v1010_v6 = vpop.f32.mrf.mxu1 }
 0x31b   : > { %v967_v7 = vadd.f32 %v1265_v3, %v787_v0 }
 0x31c   : > { %v1267_v9 = vpop.f32.mrf.mxu0  ;;  %v1316_v10 = vpop.f32.mrf.mxu1 }
 0x31d   : > { %v1008_v11 = vadd.f32 %v1007_v63, %v967_v7  ;;  %v1268_v13 = vadd.f32 %v1267_v9, %v1266_v5 }
 0x31f   : > { %v1014_v14 = vmax.f32 %v1008_v11, 0.0  ;;  %v970_v16 = vadd.f32 %v1268_v13, %v787_v0 }
 0x321   : > { %v1020_v17 = vmul.f32 %v1019_v12, %v1014_v14  ;;  %v1011_v18 = vadd.f32 %v1010_v6, %v970_v16 }
 0x323   : > { %v1026_v19 = vadd.f32 %v1025_v15, %v1020_v17  ;;  %v1015_v20 = vmax.f32 %v1011_v18, 0.0 }
 0x325   : > { %1028 = vst [vmem:[%s287_s26] sm:$0xff] %v1026_v19  ;;  %v1021_v21 = vmul.f32 %v1019_v12, %v1015_v20 }
 0x327   : > { %v1027_v22 = vadd.f32 %v1025_v15, %v1021_v21 }
 0x329   : > { %1029 = vst [vmem:[%s287_s26 + $0x8] sm:$0xff] %v1027_v22 }
 0x32a   : > { %1508 = shalt.err (!%p1505_p3)
}
 0x32b   : > { %s1509_s29 = scalar_lea.hbm %s1768_s9, 256  ;;  %s1513_s18 = scalar_lea.hbm %s1818_s6, 512 }
 0x32c   : > { %p1510_p2 = scmp.ne.s32.totalorder %s1768_s9, %s1509_s29  ;;  %p1514_p7 = scmp.lt.s32.totalorder %s1768_s9, %s1818_s6 }
 0x32d   : > { %p1515_p6 = scmp.lt.s32.totalorder %s1513_s18, %s1509_s29 }
 0x32e   : > { %p1511_p4 = pnand %p1510_p2, %p1650_p5 }
 0x32f   : > { %p1516_p9 = por %p1515_p6, %p1514_p7 }
 0x330   : > { %p1512_p13 = pneg %p1511_p4 }
 0x332   : > { %p1517_p10 = pnand %p1516_p9, %p1512_p13 }
 0x334   : > { %1520 = shalt.err (!%p1517_p10)
}
 0x335   : > { %s1575_s26 = smov 128   ;;  %s1576_s10 = smov 8  }
 0x336   : > { %1325 = dma.vmem_to_hbm [thread:$0]  (%p1650_p5), %s1770_s28, 256, %s1768_s9, %s1772_s12, %s1575_s26, %s1575_s26, %s1576_s10  }
 0x337 PF: > { %p1342_p12 = scmp.ge.s32.totalorder %s1563_s24, 2  ;;  %s1059_s11 = sand.u32 1, %s1551_s21  }
 0x338   : > { %p1828_p8 = scmp.ne.s32.totalorder %s1821_s8, 0  ;;  %s1060_s13 = scalar_lea.sflag [#allocation4], %s1059_s11 }
 0x33a   : > { %p1335_p11 = pnand %p1342_p12, %p1828_p8 }
 0x33c   : > { %p1336_p0 = pneg %p1335_p11 }
 0x33e   : > { %1546 = dma.done.wait (%p1336_p0), %s1060_s13, 256  }
 0x33f   : > { %1548 = vsyncadd (%p1336_p0), %s1060_s13, 4294967040  ;;  %p18_p1 = scmp.ge.s32.totalorder %s1637_s27, 4   ;;  %s1829_s21 = smov %s1555_s22 }
 0x340   : > { %s1830_s22 = smov %s1559_s23  ;;  %s1831_s23 = smov %s1648_s30 }
 0x341   : > { %s1832_s24 = smov %s1637_s27  ;;  %20 = sbr.rel (!%p18_p1) target bundleno = 5 (0x5), region = 91 }
 0x346   :  { %1065 = vsyncpa [#allocation3], 1 }
 0x347   :  { %1067 = vsyncpa [#allocation3 + $0x1], 1 }
 0x348   :  { %1068 = vsyncpa [#allocation6], 1 }
 0x349   :  { %1069 = vsyncpa [#allocation4], 1 }
 0x34a   :  { %1071 = vsyncpa [#allocation4 + $0x1], 1 }

</bundles_post_ra>
